<compile_context>
chip_gen: v7x
topology: tpu7x:2x2x1
jax: 0.10.0
libtpu: 0.0.40
codegen_flags: <defaults>
</compile_context>

<pallas_src>
import math
import functools

import jax
import jax.numpy as jnp
from jax import lax
from jax.experimental import pallas as pl
from jax.experimental.pallas import tpu as pltpu


def _layernorm(x, gamma, beta, eps=1e-5):
    # x: (R, D) f32; gamma/beta: (1, D) f32
    mean = jnp.mean(x, axis=-1, keepdims=True)
    var = jnp.mean((x - mean) ** 2, axis=-1, keepdims=True)
    return (x - mean) * lax.rsqrt(var + eps) * gamma + beta


def encoder_block_kernel(
    # inputs
    x_ref,                     # (Bblk, S, D)        f32
    vlen_ref,                  # (Bblk*H, 1, 1)      int32  valid len per (batch, head)
    wqkv_ref,                  # (Bblk*H, D, 3*Dh)   matmul dtype (per-head fused Wq|Wk|Wv)
    wo_ref,                    # (Bblk*H, Dh, D)     matmul dtype (Wo split per head)
    ln1_g_ref, ln1_b_ref,      # (1, D) f32
    w1_ref, b1_ref,            # (D, F) matmul dtype, (1, F) f32
    w2_ref, b2_ref,            # (F, D) matmul dtype, (1, D) f32
    ln2_g_ref, ln2_b_ref,      # (1, D) f32
    # output
    o_ref,                     # (Bblk, S, D) f32
    *, num_heads, matmul_dtype,
):
    H = num_heads
    Bblk, S, D = x_ref.shape
    Dh = D // H
    G = Bblk * H                      # batch*heads folded into one batch axis
    R = Bblk * S                      # batch*seq rows folded for position-wise ops
    scale = 1.0 / math.sqrt(Dh)

    x = x_ref[...]                    # (Bblk, S, D) f32
    xc = x.astype(matmul_dtype)

    # ---- QKV projection, batched over (batch*heads).  Output is already
    #      (G, S, 3*Dh): no per-head lane slicing / stacking inside the kernel.
    xg = jnp.broadcast_to(xc[:, None], (Bblk, H, S, D)).reshape(G, S, D)
    qkv = jnp.einsum("gsd,gde->gse", xg, wqkv_ref[...],
                     preferred_element_type=jnp.float32)      # (G, S, 3*Dh) f32
    qkv = qkv.astype(matmul_dtype)                            # cast once, reuse
    q = qkv[:, :, :Dh]
    k = qkv[:, :, Dh:2 * Dh]
    v = qkv[:, :, 2 * Dh:]

    # ---- masked scaled dot-product attention (softmax in f32) ----
    scores = jnp.einsum("gqd,gkd->gqk", q, k,
                        preferred_element_type=jnp.float32) * scale    # (G, S, S)
    # Small (1, S, S) iota; the compare/where broadcasts it (no H-replicated iota).
    key_pos = lax.broadcasted_iota(jnp.int32, (1, S, S), 2)
    scores = jnp.where(key_pos < vlen_ref[...], scores, -1e6)          # d2l masked_softmax
    scores = scores - jnp.max(scores, axis=-1, keepdims=True)
    p = jnp.exp(scores)
    p = p * pl.reciprocal(jnp.sum(p, axis=-1, keepdims=True), approx=True)

    ctx = jnp.einsum("gqk,gkd->gqd", p.astype(matmul_dtype), v,
                     preferred_element_type=jnp.float32)      # (G, S, Dh) f32

    # ---- output projection fused per head; heads merged by summation ----
    #      (replaces the per-head masked stores into a VMEM scratch + Wo dot)
    proj = jnp.einsum("gqd,gde->gqe", ctx.astype(matmul_dtype), wo_ref[...],
                      preferred_element_type=jnp.float32)     # (G, S, D) f32
    attn = jnp.concatenate(
        [sum(proj[b * H + h] for h in range(H)) for b in range(Bblk)],
        axis=0)                                               # (R, D) f32

    # ---- AddNorm 1 (f32), rows folded ----
    y = _layernorm(x.reshape(R, D) + attn, ln1_g_ref[...], ln1_b_ref[...])

    # ---- position-wise FFN: one MXU pass per matmul over all folded rows ----
    h1 = jnp.dot(y.astype(matmul_dtype), w1_ref[...],
                 preferred_element_type=jnp.float32) + b1_ref[...]
    h1 = jnp.maximum(h1, 0.0)
    ffn = jnp.dot(h1.astype(matmul_dtype), w2_ref[...],
                  preferred_element_type=jnp.float32) + b2_ref[...]

    # ---- AddNorm 2 (f32) ----
    out = _layernorm(y + ffn, ln2_g_ref[...], ln2_b_ref[...])
    o_ref[...] = out.reshape(Bblk, S, D)


def encoder_block(x, valid_lens, params, *, num_heads,
                  matmul_dtype=jnp.bfloat16, num_batch_blocks=None):
    """x: (B, S, D) f32; valid_lens: (B,) int; params: dict of f32 weights."""
    B, S, D = x.shape
    F = params["w1"].shape[1]
    H = num_heads
    assert D % H == 0
    Dh = D // H

    if num_batch_blocks is None:
        # v7x has two TensorCores per chip -> two "parallel" grid steps; on
        # single-TC chips (v5e/v6e) use grid=(1,) so all rows fold into one pass
        # and there is no per-step (~0.35 us) grid overhead.
        kind = jax.devices()[0].device_kind.lower().replace(" ", "")
        num_batch_blocks = 2 if (("v7" in kind or "7x" in kind) and B % 2 == 0) else 1
    assert B % num_batch_blocks == 0
    Bblk = B // num_batch_blocks
    G = Bblk * H

    # ---- wrapper-side weight restructuring (free at trace time) ----
    # Per-head projection weights, Q|K|V fused along the output axis and tiled
    # over the in-kernel batch block -> the QKV projection is one head-batched
    # einsum with no in-kernel head slicing.  bf16 weights halve DMA / VMEM
    # bytes; accumulation stays f32 inside the kernel.
    def per_head(w):                      # (D, D) -> (H, D, Dh)
        return w.reshape(D, H, Dh).transpose(1, 0, 2)

    wqkv_h = jnp.concatenate(
        [per_head(params["wq"]), per_head(params["wk"]), per_head(params["wv"])],
        axis=2)                                                    # (H, D, 3*Dh)
    wqkv_g = jnp.tile(wqkv_h, (Bblk, 1, 1)).astype(matmul_dtype)   # (G, D, 3*Dh)
    wo_g = jnp.tile(params["wo"].reshape(H, Dh, D),
                    (Bblk, 1, 1)).astype(matmul_dtype)             # (G, Dh, D)
    w1 = params["w1"].astype(matmul_dtype)
    w2 = params["w2"].astype(matmul_dtype)

    # valid length per (batch, head) — the torch.repeat_interleave of the spec.
    valid_g = jnp.repeat(valid_lens.astype(jnp.int32), H).reshape(B * H, 1, 1)

    def full(shape):
        n = len(shape)
        return pl.BlockSpec(shape, lambda b: (0,) * n)

    kernel = functools.partial(encoder_block_kernel,
                               num_heads=H, matmul_dtype=matmul_dtype)

    # NOTE: at real sizes, mark the grid-invariant weight specs below with
    # pipeline_mode=pl.Buffered(1) on v7x to halve their VMEM reservation;
    # left at the default here (weights are a few KiB and the grid has <= 2 steps).
    grid_spec = pltpu.PrefetchScalarGridSpec(
        num_scalar_prefetch=0,
        grid=(num_batch_blocks,),
        in_specs=[
            pl.BlockSpec((Bblk, S, D), lambda b: (b, 0, 0)),       # x
            pl.BlockSpec((G, 1, 1), lambda b: (b, 0, 0)),          # valid per (batch, head)
            full((G, D, 3 * Dh)),                                  # fused per-head Wqkv
            full((G, Dh, D)),                                      # per-head Wo
            full((1, D)), full((1, D)),                            # ln1 gamma/beta
            full((D, F)), full((1, F)),                            # ffn dense1 W, b
            full((F, D)), full((1, D)),                            # ffn dense2 W, b
            full((1, D)), full((1, D)),                            # ln2 gamma/beta
        ],
        out_specs=pl.BlockSpec((Bblk, S, D), lambda b: (b, 0, 0)),
    )

    return pl.pallas_call(
        kernel,
        out_shape=jax.ShapeDtypeStruct((B, S, D), jnp.float32),
        grid_spec=grid_spec,
        compiler_params=pltpu.CompilerParams(
            dimension_semantics=("parallel",),
            # Headroom below v7x's 64 MiB physical VMEM; v5e/v6e have 128 MiB,
            # raise this when tiles grow at real sizes.
            vmem_limit_bytes=48 * 1024 * 1024,
        ),
    )(
        x, valid_g, wqkv_g, wo_g,
        params["ln1_g"], params["ln1_b"],
        w1, params["b1"], w2, params["b2"],
        params["ln2_g"], params["ln2_b"],
    )


# ----------------------- pure-JAX reference ----------------------------------
def encoder_block_ref(x, valid_lens, params, *, num_heads):
    B, S, D = x.shape
    Dh = D // num_heads

    def ln(z, g, b, eps=1e-5):
        m = jnp.mean(z, -1, keepdims=True)
        v = jnp.mean((z - m) ** 2, -1, keepdims=True)
        return (z - m) / jnp.sqrt(v + eps) * g + b

    q = x @ params["wq"]
    k = x @ params["wk"]
    v = x @ params["wv"]

    def split(t):  # (B,S,D) -> (B,H,S,Dh)
        return t.reshape(B, S, num_heads, Dh).transpose(0, 2, 1, 3)

    qh, kh, vh = split(q), split(k), split(v)
    scores = jnp.einsum("bhqd,bhkd->bhqk", qh, kh) / math.sqrt(Dh)
    mask = jnp.arange(S)[None, None, None, :] < valid_lens[:, None, None, None]
    scores = jnp.where(mask, scores, -1e6)
    p = jax.nn.softmax(scores, axis=-1)
    o = jnp.einsum("bhqk,bhkd->bhqd", p, vh)
    o = o.transpose(0, 2, 1, 3).reshape(B, S, D) @ params["wo"]

    y = ln(x + o, params["ln1_g"][0], params["ln1_b"][0])
    ffn = jnp.maximum(y @ params["w1"] + params["b1"][0], 0.0) @ params["w2"] + params["b2"][0]
    return ln(y + ffn, params["ln2_g"][0], params["ln2_b"][0])


if __name__ == "__main__":
    B, S, D, H, F = 2, 8, 32, 4, 64   # batch, seq, num_hiddens, heads, ffn_hiddens

    key = jax.random.PRNGKey(0)
    keys = jax.random.split(key, 10)
    init = lambda k, shape: (0.1 * jax.random.normal(k, shape)).astype(jnp.float32)

    params = {
        "wq": init(keys[0], (D, D)),
        "wk": init(keys[1], (D, D)),
        "wv": init(keys[2], (D, D)),
        "wo": init(keys[3], (D, D)),
        "ln1_g": jnp.ones((1, D), jnp.float32),
        "ln1_b": jnp.zeros((1, D), jnp.float32),
        "w1": init(keys[4], (D, F)),
        "b1": init(keys[5], (1, F)),
        "w2": init(keys[6], (F, D)),
        "b2": init(keys[7], (1, D)),
        "ln2_g": jnp.ones((1, D), jnp.float32),
        "ln2_b": jnp.zeros((1, D), jnp.float32),
    }

    x = jax.random.normal(keys[8], (B, S, D), jnp.float32)
    valid_lens = jnp.array([5, 8], dtype=jnp.int32)

    ref = encoder_block_ref(x, valid_lens, params, num_heads=H)

    # f32-matmul path, single fused grid step: tight semantic check
    # (only the approximate softmax reciprocal deviates).
    out_f32 = jax.block_until_ready(
        encoder_block(x, valid_lens, params, num_heads=H,
                      matmul_dtype=jnp.float32, num_batch_blocks=1))
    assert out_f32.shape == (B, S, D)
    assert jnp.allclose(out_f32, ref, atol=1e-2, rtol=1e-2), \
        float(jnp.max(jnp.abs(out_f32 - ref)))

    # bf16 fast path, 2 parallel grid steps (v7x megacore configuration).
    out_bf16_2 = jax.block_until_ready(
        encoder_block(x, valid_lens, params, num_heads=H,
                      matmul_dtype=jnp.bfloat16, num_batch_blocks=2))
    assert jnp.allclose(out_bf16_2, ref, atol=5e-2, rtol=5e-2), \
        float(jnp.max(jnp.abs(out_bf16_2 - ref)))

    # bf16 fast path, auto block count (1 on v5e/v6e, 2 on v7x).
    out_bf16 = jax.block_until_ready(
        encoder_block(x, valid_lens, params, num_heads=H,
                      matmul_dtype=jnp.bfloat16))
    assert jnp.allclose(out_bf16, ref, atol=5e-2, rtol=5e-2), \
        float(jnp.max(jnp.abs(out_bf16 - ref)))

    print("KERNEL_OK")
</pallas_src>

<mosaic_0001>
module attributes {stable_mosaic.version = 11 : i64} {
  func.func @encoder_block_kernel(%arg0: i32, %arg1: memref<2x8x32xf32, #tpu.memory_space<vmem>>, %arg2: memref<8x1x1xi32, #tpu.memory_space<vmem>>, %arg3: memref<8x32x24xf32, #tpu.memory_space<vmem>>, %arg4: memref<8x8x32xf32, #tpu.memory_space<vmem>>, %arg5: memref<1x32xf32, #tpu.memory_space<vmem>>, %arg6: memref<1x32xf32, #tpu.memory_space<vmem>>, %arg7: memref<32x64xf32, #tpu.memory_space<vmem>>, %arg8: memref<1x64xf32, #tpu.memory_space<vmem>>, %arg9: memref<64x32xf32, #tpu.memory_space<vmem>>, %arg10: memref<1x32xf32, #tpu.memory_space<vmem>>, %arg11: memref<1x32xf32, #tpu.memory_space<vmem>>, %arg12: memref<1x32xf32, #tpu.memory_space<vmem>>, %arg13: memref<2x8x32xf32, #tpu.memory_space<vmem>>) attributes {dimension_semantics = [#tpu.dimension_semantics<parallel>], iteration_bounds = array<i64: 1>, scalar_prefetch = 0 : i64, scratch_operands = 0 : i64, tpu.core_type = #tpu.core_type<tc>, window_params = [{transform_indices = @transform_0, window_bounds = array<i64: 2, 8, 32>}, {transform_indices = @transform_1, window_bounds = array<i64: 8, 1, 1>}, {pipeline_mode = #tpu.pipeline_mode<synchronous>, transform_indices = @transform_2, window_bounds = array<i64: 8, 32, 24>}, {pipeline_mode = #tpu.pipeline_mode<synchronous>, transform_indices = @transform_3, window_bounds = array<i64: 8, 8, 32>}, {pipeline_mode = #tpu.pipeline_mode<synchronous>, transform_indices = @transform_4, window_bounds = array<i64: 1, 32>}, {pipeline_mode = #tpu.pipeline_mode<synchronous>, transform_indices = @transform_5, window_bounds = array<i64: 1, 32>}, {pipeline_mode = #tpu.pipeline_mode<synchronous>, transform_indices = @transform_6, window_bounds = array<i64: 32, 64>}, {pipeline_mode = #tpu.pipeline_mode<synchronous>, transform_indices = @transform_7, window_bounds = array<i64: 1, 64>}, {pipeline_mode = #tpu.pipeline_mode<synchronous>, transform_indices = @transform_8, window_bounds = array<i64: 64, 32>}, {pipeline_mode = #tpu.pipeline_mode<synchronous>, transform_indices = @transform_9, window_bounds = array<i64: 1, 32>}, {pipeline_mode = #tpu.pipeline_mode<synchronous>, transform_indices = @transform_10, window_bounds = array<i64: 1, 32>}, {pipeline_mode = #tpu.pipeline_mode<synchronous>, transform_indices = @transform_11, window_bounds = array<i64: 1, 32>}, {transform_indices = @transform_12, window_bounds = array<i64: 2, 8, 32>}]} {
    %c0 = arith.constant 0 : index
    %c0_0 = arith.constant 0 : index
    %c0_1 = arith.constant 0 : index
    %0 = vector.load %arg1[%c0, %c0_0, %c0_1] : memref<2x8x32xf32, #tpu.memory_space<vmem>>, vector<2x8x32xf32>
    %1 = vector.shape_cast %0 : vector<2x8x32xf32> to vector<2x1x8x32xf32>
    %2 = vector.shape_cast %1 : vector<2x1x8x32xf32> to vector<2x1x8x32xf32>
    %3 = vector.broadcast %2 : vector<2x1x8x32xf32> to vector<2x4x8x32xf32>
    %4 = vector.shape_cast %3 : vector<2x4x8x32xf32> to vector<8x8x32xf32>
    %c0_2 = arith.constant 0 : index
    %c0_3 = arith.constant 0 : index
    %c0_4 = arith.constant 0 : index
    %5 = vector.load %arg3[%c0_2, %c0_3, %c0_4] : memref<8x32x24xf32, #tpu.memory_space<vmem>>, vector<8x32x24xf32>
    "tpu.trace_start"() <{level = 10 : i32, message = "gsd,gde->gse"}> : () -> ()
    %cst = arith.constant dense<0.000000e+00> : vector<8x8x24xf32>
    %6 = tpu.matmul %4, %5, %cst {dimension_numbers = #tpu.dot_dimension_numbers<[2], [1], [1], [2], [0, 0, 0, 1, 1, 2], [0], [0]>} : vector<8x8x32xf32>, vector<8x32x24xf32>, vector<8x8x24xf32> -> vector<8x8x24xf32>
    "tpu.trace_stop"() : () -> ()
    %7 = vector.extract_strided_slice %6 {offsets = [0, 0, 0], sizes = [8, 8, 8], strides = [1, 1, 1]} : vector<8x8x24xf32> to vector<8x8x8xf32>
    %8 = vector.extract_strided_slice %6 {offsets = [0, 0, 8], sizes = [8, 8, 8], strides = [1, 1, 1]} : vector<8x8x24xf32> to vector<8x8x8xf32>
    %9 = vector.extract_strided_slice %6 {offsets = [0, 0, 16], sizes = [8, 8, 8], strides = [1, 1, 1]} : vector<8x8x24xf32> to vector<8x8x8xf32>
    "tpu.trace_start"() <{level = 10 : i32, message = "gqd,gkd->gqk"}> : () -> ()
    %cst_5 = arith.constant dense<0.000000e+00> : vector<8x8x8xf32>
    %10 = tpu.matmul %7, %8, %cst_5 {dimension_numbers = #tpu.dot_dimension_numbers<[2], [2], [1], [1], [0, 0, 0, 1, 1, 1], [0], [0]>} : vector<8x8x8xf32>, vector<8x8x8xf32>, vector<8x8x8xf32> -> vector<8x8x8xf32>
    "tpu.trace_stop"() : () -> ()
    %cst_6 = arith.constant 0.353553385 : f32
    %11 = vector.broadcast %cst_6 : f32 to vector<8x8x8xf32>
    %12 = arith.mulf %10, %11 : vector<8x8x8xf32>
    %13 = tpu.iota {dimensions = array<i32: 2>} : vector<1x8x8xi32>
    %c0_7 = arith.constant 0 : index
    %c0_8 = arith.constant 0 : index
    %c0_9 = arith.constant 0 : index
    %14 = vector.load %arg2[%c0_7, %c0_8, %c0_9] : memref<8x1x1xi32, #tpu.memory_space<vmem>>, vector<8x1x1xi32>
    %15 = vector.broadcast %13 : vector<1x8x8xi32> to vector<8x8x8xi32>
    %16 = vector.broadcast %14 : vector<8x1x1xi32> to vector<8x8x8xi32>
    %17 = arith.cmpi slt, %15, %16 : vector<8x8x8xi32>
    %cst_10 = arith.constant -1.000000e+06 : f32
    %18 = vector.broadcast %cst_10 : f32 to vector<8x8x8xf32>
    %19 = arith.select %17, %12, %18 : vector<8x8x8xi1>, vector<8x8x8xf32>
    %cst_11 = arith.constant dense<0xFF800000> : vector<8x8xf32>
    %20 = vector.multi_reduction <maximumf>, %19, %cst_11 [2] : vector<8x8x8xf32> to vector<8x8xf32>
    %21 = vector.shape_cast %20 : vector<8x8xf32> to vector<8x8x1xf32>
    %22 = vector.broadcast %21 : vector<8x8x1xf32> to vector<8x8x8xf32>
    %23 = arith.subf %19, %22 : vector<8x8x8xf32>
    %24 = math.exp %23 : vector<8x8x8xf32>
    %cst_12 = arith.constant dense<0.000000e+00> : vector<8x8xf32>
    %25 = vector.multi_reduction <add>, %24, %cst_12 [2] : vector<8x8x8xf32> to vector<8x8xf32>
    %26 = vector.shape_cast %25 : vector<8x8xf32> to vector<8x8x1xf32>
    %27 = tpu.reciprocal %26 {approx = true} : vector<8x8x1xf32> -> vector<8x8x1xf32>
    %28 = vector.broadcast %27 : vector<8x8x1xf32> to vector<8x8x8xf32>
    %29 = arith.mulf %24, %28 : vector<8x8x8xf32>
    "tpu.trace_start"() <{level = 10 : i32, message = "gqk,gkd->gqd"}> : () -> ()
    %cst_13 = arith.constant dense<0.000000e+00> : vector<8x8x8xf32>
    %30 = tpu.matmul %29, %9, %cst_13 {dimension_numbers = #tpu.dot_dimension_numbers<[2], [1], [1], [2], [0, 0, 0, 1, 1, 2], [0], [0]>} : vector<8x8x8xf32>, vector<8x8x8xf32>, vector<8x8x8xf32> -> vector<8x8x8xf32>
    "tpu.trace_stop"() : () -> ()
    %c0_14 = arith.constant 0 : index
    %c0_15 = arith.constant 0 : index
    %c0_16 = arith.constant 0 : index
    %31 = vector.load %arg4[%c0_14, %c0_15, %c0_16] : memref<8x8x32xf32, #tpu.memory_space<vmem>>, vector<8x8x32xf32>
    "tpu.trace_start"() <{level = 10 : i32, message = "gqd,gde->gqe"}> : () -> ()
    %cst_17 = arith.constant dense<0.000000e+00> : vector<8x8x32xf32>
    %32 = tpu.matmul %30, %31, %cst_17 {dimension_numbers = #tpu.dot_dimension_numbers<[2], [1], [1], [2], [0, 0, 0, 1, 1, 2], [0], [0]>} : vector<8x8x8xf32>, vector<8x8x32xf32>, vector<8x8x32xf32> -> vector<8x8x32xf32>
    "tpu.trace_stop"() : () -> ()
    %33 = vector.extract_strided_slice %32 {offsets = [0, 0, 0], sizes = [1, 8, 32], strides = [1, 1, 1]} : vector<8x8x32xf32> to vector<1x8x32xf32>
    %34 = vector.shape_cast %33 : vector<1x8x32xf32> to vector<8x32xf32>
    %cst_18 = arith.constant 0.000000e+00 : f32
    %35 = vector.broadcast %cst_18 : f32 to vector<8x32xf32>
    %36 = arith.addf %35, %34 : vector<8x32xf32>
    %37 = vector.extract_strided_slice %32 {offsets = [1, 0, 0], sizes = [1, 8, 32], strides = [1, 1, 1]} : vector<8x8x32xf32> to vector<1x8x32xf32>
    %38 = vector.shape_cast %37 : vector<1x8x32xf32> to vector<8x32xf32>
    %39 = arith.addf %36, %38 : vector<8x32xf32>
    %40 = vector.extract_strided_slice %32 {offsets = [2, 0, 0], sizes = [1, 8, 32], strides = [1, 1, 1]} : vector<8x8x32xf32> to vector<1x8x32xf32>
    %41 = vector.shape_cast %40 : vector<1x8x32xf32> to vector<8x32xf32>
    %42 = arith.addf %39, %41 : vector<8x32xf32>
    %43 = vector.extract_strided_slice %32 {offsets = [3, 0, 0], sizes = [1, 8, 32], strides = [1, 1, 1]} : vector<8x8x32xf32> to vector<1x8x32xf32>
    %44 = vector.shape_cast %43 : vector<1x8x32xf32> to vector<8x32xf32>
    %45 = arith.addf %42, %44 : vector<8x32xf32>
    %46 = vector.extract_strided_slice %32 {offsets = [4, 0, 0], sizes = [1, 8, 32], strides = [1, 1, 1]} : vector<8x8x32xf32> to vector<1x8x32xf32>
    %47 = vector.shape_cast %46 : vector<1x8x32xf32> to vector<8x32xf32>
    %cst_19 = arith.constant 0.000000e+00 : f32
    %48 = vector.broadcast %cst_19 : f32 to vector<8x32xf32>
    %49 = arith.addf %48, %47 : vector<8x32xf32>
    %50 = vector.extract_strided_slice %32 {offsets = [5, 0, 0], sizes = [1, 8, 32], strides = [1, 1, 1]} : vector<8x8x32xf32> to vector<1x8x32xf32>
    %51 = vector.shape_cast %50 : vector<1x8x32xf32> to vector<8x32xf32>
    %52 = arith.addf %49, %51 : vector<8x32xf32>
    %53 = vector.extract_strided_slice %32 {offsets = [6, 0, 0], sizes = [1, 8, 32], strides = [1, 1, 1]} : vector<8x8x32xf32> to vector<1x8x32xf32>
    %54 = vector.shape_cast %53 : vector<1x8x32xf32> to vector<8x32xf32>
    %55 = arith.addf %52, %54 : vector<8x32xf32>
    %56 = vector.extract_strided_slice %32 {offsets = [7, 0, 0], sizes = [1, 8, 32], strides = [1, 1, 1]} : vector<8x8x32xf32> to vector<1x8x32xf32>
    %57 = vector.shape_cast %56 : vector<1x8x32xf32> to vector<8x32xf32>
    %58 = arith.addf %55, %57 : vector<8x32xf32>
    %59 = tpu.concatenate %45, %58 in 0 : vector<8x32xf32>, vector<8x32xf32> -> vector<16x32xf32>
    %60 = vector.shape_cast %0 : vector<2x8x32xf32> to vector<16x32xf32>
    %61 = arith.addf %60, %59 : vector<16x32xf32>
    %c0_20 = arith.constant 0 : index
    %c0_21 = arith.constant 0 : index
    %62 = vector.load %arg5[%c0_20, %c0_21] : memref<1x32xf32, #tpu.memory_space<vmem>>, vector<1x32xf32>
    %c0_22 = arith.constant 0 : index
    %c0_23 = arith.constant 0 : index
    %63 = vector.load %arg6[%c0_22, %c0_23] : memref<1x32xf32, #tpu.memory_space<vmem>>, vector<1x32xf32>
    %cst_24 = arith.constant dense<0.000000e+00> : vector<16xf32>
    %64 = vector.multi_reduction <add>, %61, %cst_24 [1] : vector<16x32xf32> to vector<16xf32>
    %65 = vector.shape_cast %64 : vector<16xf32> to vector<16x1xf32>
    %cst_25 = arith.constant 3.200000e+01 : f32
    %66 = vector.broadcast %cst_25 : f32 to vector<16x1xf32>
    %67 = arith.divf %65, %66 : vector<16x1xf32>
    %68 = vector.broadcast %67 : vector<16x1xf32> to vector<16x32xf32>
    %69 = arith.subf %61, %68 : vector<16x32xf32>
    %70 = arith.mulf %69, %69 : vector<16x32xf32>
    %cst_26 = arith.constant dense<0.000000e+00> : vector<16xf32>
    %71 = vector.multi_reduction <add>, %70, %cst_26 [1] : vector<16x32xf32> to vector<16xf32>
    %72 = vector.shape_cast %71 : vector<16xf32> to vector<16x1xf32>
    %cst_27 = arith.constant 3.200000e+01 : f32
    %73 = vector.broadcast %cst_27 : f32 to vector<16x1xf32>
    %74 = arith.divf %72, %73 : vector<16x1xf32>
    %75 = vector.broadcast %67 : vector<16x1xf32> to vector<16x32xf32>
    %76 = arith.subf %61, %75 : vector<16x32xf32>
    %cst_28 = arith.constant 9.99999974E-6 : f32
    %77 = vector.broadcast %cst_28 : f32 to vector<16x1xf32>
    %78 = arith.addf %74, %77 : vector<16x1xf32>
    %79 = math.rsqrt %78 : vector<16x1xf32>
    %80 = vector.broadcast %79 : vector<16x1xf32> to vector<16x32xf32>
    %81 = arith.mulf %76, %80 : vector<16x32xf32>
    %82 = vector.broadcast %62 : vector<1x32xf32> to vector<16x32xf32>
    %83 = arith.mulf %81, %82 : vector<16x32xf32>
    %84 = vector.broadcast %63 : vector<1x32xf32> to vector<16x32xf32>
    %85 = arith.addf %83, %84 : vector<16x32xf32>
    %c0_29 = arith.constant 0 : index
    %c0_30 = arith.constant 0 : index
    %86 = vector.load %arg7[%c0_29, %c0_30] : memref<32x64xf32, #tpu.memory_space<vmem>>, vector<32x64xf32>
    %cst_31 = arith.constant dense<0.000000e+00> : vector<16x64xf32>
    %87 = tpu.matmul %85, %86, %cst_31 {dimension_numbers = #tpu.dot_dimension_numbers<[1], [0], [0], [1], [0, 0, 1, 1], [], []>} : vector<16x32xf32>, vector<32x64xf32>, vector<16x64xf32> -> vector<16x64xf32>
    %c0_32 = arith.constant 0 : index
    %c0_33 = arith.constant 0 : index
    %88 = vector.load %arg8[%c0_32, %c0_33] : memref<1x64xf32, #tpu.memory_space<vmem>>, vector<1x64xf32>
    %89 = vector.broadcast %88 : vector<1x64xf32> to vector<16x64xf32>
    %90 = arith.addf %87, %89 : vector<16x64xf32>
    %cst_34 = arith.constant 0.000000e+00 : f32
    %91 = vector.broadcast %cst_34 : f32 to vector<16x64xf32>
    %92 = arith.maximumf %90, %91 : vector<16x64xf32>
    %c0_35 = arith.constant 0 : index
    %c0_36 = arith.constant 0 : index
    %93 = vector.load %arg9[%c0_35, %c0_36] : memref<64x32xf32, #tpu.memory_space<vmem>>, vector<64x32xf32>
    %cst_37 = arith.constant dense<0.000000e+00> : vector<16x32xf32>
    %94 = tpu.matmul %92, %93, %cst_37 {dimension_numbers = #tpu.dot_dimension_numbers<[1], [0], [0], [1], [0, 0, 1, 1], [], []>} : vector<16x64xf32>, vector<64x32xf32>, vector<16x32xf32> -> vector<16x32xf32>
    %c0_38 = arith.constant 0 : index
    %c0_39 = arith.constant 0 : index
    %95 = vector.load %arg10[%c0_38, %c0_39] : memref<1x32xf32, #tpu.memory_space<vmem>>, vector<1x32xf32>
    %96 = vector.broadcast %95 : vector<1x32xf32> to vector<16x32xf32>
    %97 = arith.addf %94, %96 : vector<16x32xf32>
    %98 = arith.addf %85, %97 : vector<16x32xf32>
    %c0_40 = arith.constant 0 : index
    %c0_41 = arith.constant 0 : index
    %99 = vector.load %arg11[%c0_40, %c0_41] : memref<1x32xf32, #tpu.memory_space<vmem>>, vector<1x32xf32>
    %c0_42 = arith.constant 0 : index
    %c0_43 = arith.constant 0 : index
    %100 = vector.load %arg12[%c0_42, %c0_43] : memref<1x32xf32, #tpu.memory_space<vmem>>, vector<1x32xf32>
    %cst_44 = arith.constant dense<0.000000e+00> : vector<16xf32>
    %101 = vector.multi_reduction <add>, %98, %cst_44 [1] : vector<16x32xf32> to vector<16xf32>
    %102 = vector.shape_cast %101 : vector<16xf32> to vector<16x1xf32>
    %cst_45 = arith.constant 3.200000e+01 : f32
    %103 = vector.broadcast %cst_45 : f32 to vector<16x1xf32>
    %104 = arith.divf %102, %103 : vector<16x1xf32>
    %105 = vector.broadcast %104 : vector<16x1xf32> to vector<16x32xf32>
    %106 = arith.subf %98, %105 : vector<16x32xf32>
    %107 = arith.mulf %106, %106 : vector<16x32xf32>
    %cst_46 = arith.constant dense<0.000000e+00> : vector<16xf32>
    %108 = vector.multi_reduction <add>, %107, %cst_46 [1] : vector<16x32xf32> to vector<16xf32>
    %109 = vector.shape_cast %108 : vector<16xf32> to vector<16x1xf32>
    %cst_47 = arith.constant 3.200000e+01 : f32
    %110 = vector.broadcast %cst_47 : f32 to vector<16x1xf32>
    %111 = arith.divf %109, %110 : vector<16x1xf32>
    %112 = vector.broadcast %104 : vector<16x1xf32> to vector<16x32xf32>
    %113 = arith.subf %98, %112 : vector<16x32xf32>
    %cst_48 = arith.constant 9.99999974E-6 : f32
    %114 = vector.broadcast %cst_48 : f32 to vector<16x1xf32>
    %115 = arith.addf %111, %114 : vector<16x1xf32>
    %116 = math.rsqrt %115 : vector<16x1xf32>
    %117 = vector.broadcast %116 : vector<16x1xf32> to vector<16x32xf32>
    %118 = arith.mulf %113, %117 : vector<16x32xf32>
    %119 = vector.broadcast %99 : vector<1x32xf32> to vector<16x32xf32>
    %120 = arith.mulf %118, %119 : vector<16x32xf32>
    %121 = vector.broadcast %100 : vector<1x32xf32> to vector<16x32xf32>
    %122 = arith.addf %120, %121 : vector<16x32xf32>
    %123 = vector.shape_cast %122 : vector<16x32xf32> to vector<2x8x32xf32>
    %c0_49 = arith.constant 0 : index
    %c0_50 = arith.constant 0 : index
    %c0_51 = arith.constant 0 : index
    %124 = vector.load %arg13[%c0_49, %c0_50, %c0_51] : memref<2x8x32xf32, #tpu.memory_space<vmem>>, vector<2x8x32xf32>
    tpu.vector_store %arg13[%c0_49, %c0_50, %c0_51], %123 {strides = array<i32>} : memref<2x8x32xf32, #tpu.memory_space<vmem>>, vector<2x8x32xf32>,
    return
  }
  func.func @transform_0(%arg0: i32) -> (i32, i32, i32) {
    %c0_i32 = arith.constant 0 : i32
    %c0_i32_0 = arith.constant 0 : i32
    %c0_i32_1 = arith.constant 0 : i32
    return %arg0, %c0_i32, %c0_i32_0 : i32, i32, i32
  }
  func.func @transform_1(%arg0: i32) -> (i32, i32, i32) {
    %c0_i32 = arith.constant 0 : i32
    %c0_i32_0 = arith.constant 0 : i32
    %c0_i32_1 = arith.constant 0 : i32
    return %arg0, %c0_i32, %c0_i32_0 : i32, i32, i32
  }
  func.func @transform_2(%arg0: i32) -> (i32, i32, i32) {
    %c0_i32 = arith.constant 0 : i32
    %c0_i32_0 = arith.constant 0 : i32
    %c0_i32_1 = arith.constant 0 : i32
    %c0_i32_2 = arith.constant 0 : i32
    return %c0_i32, %c0_i32_0, %c0_i32_1 : i32, i32, i32
  }
  func.func @transform_3(%arg0: i32) -> (i32, i32, i32) {
    %c0_i32 = arith.constant 0 : i32
    %c0_i32_0 = arith.constant 0 : i32
    %c0_i32_1 = arith.constant 0 : i32
    %c0_i32_2 = arith.constant 0 : i32
    return %c0_i32, %c0_i32_0, %c0_i32_1 : i32, i32, i32
  }
  func.func @transform_4(%arg0: i32) -> (i32, i32) {
    %c0_i32 = arith.constant 0 : i32
    %c0_i32_0 = arith.constant 0 : i32
    %c0_i32_1 = arith.constant 0 : i32
    return %c0_i32, %c0_i32_0 : i32, i32
  }
  func.func @transform_5(%arg0: i32) -> (i32, i32) {
    %c0_i32 = arith.constant 0 : i32
    %c0_i32_0 = arith.constant 0 : i32
    %c0_i32_1 = arith.constant 0 : i32
    return %c0_i32, %c0_i32_0 : i32, i32
  }
  func.func @transform_6(%arg0: i32) -> (i32, i32) {
    %c0_i32 = arith.constant 0 : i32
    %c0_i32_0 = arith.constant 0 : i32
    %c0_i32_1 = arith.constant 0 : i32
    return %c0_i32, %c0_i32_0 : i32, i32
  }
  func.func @transform_7(%arg0: i32) -> (i32, i32) {
    %c0_i32 = arith.constant 0 : i32
    %c0_i32_0 = arith.constant 0 : i32
    %c0_i32_1 = arith.constant 0 : i32
    return %c0_i32, %c0_i32_0 : i32, i32
  }
  func.func @transform_8(%arg0: i32) -> (i32, i32) {
    %c0_i32 = arith.constant 0 : i32
    %c0_i32_0 = arith.constant 0 : i32
    %c0_i32_1 = arith.constant 0 : i32
    return %c0_i32, %c0_i32_0 : i32, i32
  }
  func.func @transform_9(%arg0: i32) -> (i32, i32) {
    %c0_i32 = arith.constant 0 : i32
    %c0_i32_0 = arith.constant 0 : i32
    %c0_i32_1 = arith.constant 0 : i32
    return %c0_i32, %c0_i32_0 : i32, i32
  }
  func.func @transform_10(%arg0: i32) -> (i32, i32) {
    %c0_i32 = arith.constant 0 : i32
    %c0_i32_0 = arith.constant 0 : i32
    %c0_i32_1 = arith.constant 0 : i32
    return %c0_i32, %c0_i32_0 : i32, i32
  }
  func.func @transform_11(%arg0: i32) -> (i32, i32) {
    %c0_i32 = arith.constant 0 : i32
    %c0_i32_0 = arith.constant 0 : i32
    %c0_i32_1 = arith.constant 0 : i32
    return %c0_i32, %c0_i32_0 : i32, i32
  }
  func.func @transform_12(%arg0: i32) -> (i32, i32, i32) {
    %c0_i32 = arith.constant 0 : i32
    %c0_i32_0 = arith.constant 0 : i32
    %c0_i32_1 = arith.constant 0 : i32
    return %arg0, %c0_i32, %c0_i32_0 : i32, i32, i32
  }
}

</mosaic_0001>

<bundles_post_ra>
// kernel: tpu_custom_call.1
= control target key start
LH: loop header
LB: loop body
LE: loop exit
PB: predicated region body
PF: predicated region fallthrough
CT: control target
= control target key end

     0   :  { %v3495_v3 = vmov 0.0|0.0   ;;  %vm3496_vm0 = vmmov 0   ;;  %v3497_v11 = vmov 0.0   ;;  %vm76_vm1 = vcmask 261120   ;;  %s4035_s0 = inlined_call_operand.vmem [shape: f32[2,8,32], index: 0, kind: input, shape index: {}]   ;;  %s4036_s1 = inlined_call_operand.vmem [shape: s32[8,1,1], index: 1, kind: input, shape index: {}]   ;;  %s4037_s2 = inlined_call_operand.vmem [shape: f32[8,32,24], index: 2, kind: input, shape index: {}]   ;;  %s4038_s3 = inlined_call_operand.vmem [shape: f32[8,8,32], index: 3, kind: input, shape index: {}]   ;;  %s4039_s4 = inlined_call_operand.vmem [shape: f32[1,32], index: 4, kind: input, shape index: {}]   ;;  %s4040_s5 = inlined_call_operand.vmem [shape: f32[1,32], index: 5, kind: input, shape index: {}]   ;;  %s4041_s6 = inlined_call_operand.vmem [shape: f32[32,64], index: 6, kind: input, shape index: {}]   ;;  %s4042_s7 = inlined_call_operand.vmem [shape: f32[1,64], index: 7, kind: input, shape index: {}]   ;;  %s4043_s8 = inlined_call_operand.vmem [shape: f32[64,32], index: 8, kind: input, shape index: {}]   ;;  %s4044_s9 = inlined_call_operand.vmem [shape: f32[1,32], index: 9, kind: input, shape index: {}]   ;;  %s4045_s10 = inlined_call_operand.vmem [shape: f32[1,32], index: 10, kind: input, shape index: {}]   ;;  %s4046_s11 = inlined_call_operand.vmem [shape: f32[1,32], index: 11, kind: input, shape index: {}]   ;;  %s4047_s12 = inlined_call_operand.hbm [shape: f32[2,8,32], index: 12, kind: output, shape index: {}]  }
   0x1   :  { %v44_v0 = vld [vmem:[%s4037_s2] sm:$0xff]  ;;  %v45_v1 = vld [vmem:[%s4037_s2 + $0x8] sm:$0xff]  ;;  %3348 = vmatprep.subr.bf16.mxu0 %v3495_v3  ;;  %3354 = vmatprep.subr.bf16.mxu1 %v3495_v3  ;;  %v46_v6 = vld [vmem:[%s4037_s2 + $0x10] sm:$0xff] }
   0x2   :  { %v48_v2 = vld [vmem:[%s4037_s2 + $0x20] sm:$0xff]  ;;  %v3349_v4 = vpack.c.bf16 %v45_v1, %v44_v0  ;;  %v49_v5 = vld [vmem:[%s4037_s2 + $0x28] sm:$0xff]  ;;  %v47_v7 = vld [vmem:[%s4037_s2 + $0x18] sm:$0xff]  ;;  %3118 = vmatprep.mubr.msk.f32.mxu0 %vm3496_vm0, %v3497_v11  ;;  %3129 = vmatprep.mubr.msk.f32.mxu1 %vm3496_vm0, %v3497_v11 }
   0x3   :  { %v3355_v8 = vpack.c.bf16 %v49_v5, %v48_v2  ;;  %v50_v9 = vld [vmem:[%s4037_s2 + $0x30] sm:$0xff]  ;;  %v51_v10 = vld [vmem:[%s4037_s2 + $0x38] sm:$0xff]  ;;  %v3352_v12 = vpack.c.bf16 %v47_v7, %v46_v6  ;;  %v52_v14 = vld [vmem:[%s4037_s2 + $0x40] sm:$0xff] }
   0x4   :  { %3350 = vmatpush3.bf16.msra.mxu0 %v3349_v4  ;;  %v3358_v13 = vpack.c.bf16 %v51_v10, %v50_v9  ;;  %v53_v15 = vld [vmem:[%s4037_s2 + $0x48] sm:$0xff]  ;;  %v56_v16 = vld [vmem:[%s4037_s2 + $0x60] sm:$0xff]  ;;  %v54_v21 = vld [vmem:[%s4037_s2 + $0x50] sm:$0xff] }
   0x5   :  { %3356 = vmatpush3.bf16.msra.mxu1 %v3355_v8  ;;  %3351 = vmatprep.subr.bf16.mxu0 %v3495_v3  ;;  %v57_v17 = vld [vmem:[%s4037_s2 + $0x68] sm:$0xff]  ;;  %v3616_v18 = vld [vmem:[%s4035_s0] sm:$0xff]  ;;  %v3361_v19 = vpack.c.bf16 %v53_v15, %v52_v14  ;;  %v55_v22 = vld [vmem:[%s4037_s2 + $0x58] sm:$0xff] }
   0x6   :  { %3357 = vmatprep.subr.bf16.mxu1 %v3495_v3  ;;  %v3367_v20 = vpack.c.bf16 %v57_v17, %v56_v16  ;;  %v58_v23 = vld [vmem:[%s4037_s2 + $0x70] sm:$0xff]  ;;  %v59_v24 = vld [vmem:[%s4037_s2 + $0x78] sm:$0xff]  ;;  %v3364_v25 = vpack.c.bf16 %v55_v22, %v54_v21 }
   0x8   :  { %3353 = vmatpush3.bf16.msra.mxu0 %v3352_v12 }
   0x9   :  { %3359 = vmatpush3.bf16.msra.mxu1 %v3358_v13  ;;  %3360 = vmatprep.subr.bf16.mxu0 %v3495_v3 }
   0xa   :  { %3366 = vmatprep.subr.bf16.mxu1 %v3495_v3 }
   0xb   :  { %3119 = vmatmul.mubr.msk.f32.vlgmr.msra.gmra.mrb[0].mxu0 %vm76_vm1, %v3616_v18 }
   0xc   :  { %3130 = vmatmul.mubr.msk.f32.vlgmr.msra.gmra.mrb[0].mxu1 %vm76_vm1, %v3616_v18  ;;  %3362 = vmatpush3.bf16.msra.mxu0 %v3361_v19 }
   0xd   :  { %17 = vsyncpa [#allocation3], 0  ;;  %3368 = vmatpush3.bf16.msra.mxu1 %v3367_v20  ;;  %3363 = vmatprep.subr.bf16.mxu0 %v3495_v3  ;;  %v3370_v26 = vpack.c.bf16 %v59_v24, %v58_v23  ;;  %v60_v27 = vld [vmem:[%s4037_s2 + $0x80] sm:$0xff]  ;;  %v61_v28 = vld [vmem:[%s4037_s2 + $0x88] sm:$0xff]  ;;  %v3499_v63 = vmov 0   ;;  %vm646_vm2 = vcmask 64512   ;;  %v1268_v23 = vlaneseq }
   0xe   :  { %3369 = vmatprep.subr.bf16.mxu1 %v3495_v3  ;;  %3140 = vmatprep.mubr.msk.f32.mxu0 %vm3496_vm0, %v3497_v11  ;;  %v64_v29 = vld [vmem:[%s4037_s2 + $0xa0] sm:$0xff]  ;;  %v65_v30 = vld [vmem:[%s4037_s2 + $0xa8] sm:$0xff]  ;;  %v3373_v31 = vpack.c.bf16 %v61_v28, %v60_v27  ;;  %v62_v33 = vld [vmem:[%s4037_s2 + $0x90] sm:$0xff]  ;;  %vm2802_vm11 = vcmask 523264   ;;  %s3501_s15 = smov [#allocation2]  }
   0xf   :  { %3151 = vmatprep.mubr.msk.f32.mxu1 %vm3496_vm0, %v3497_v11  ;;  %v3379_v32 = vpack.c.bf16 %v65_v30, %v64_v29  ;;  %v63_v34 = vld [vmem:[%s4037_s2 + $0x98] sm:$0xff]  ;;  %v66_v35 = vld [vmem:[%s4037_s2 + $0xb0] sm:$0xff]  ;;  %v68_v39 = vld [vmem:[%s4037_s2 + $0xc0] sm:$0xff]  ;;  %3430 = vset.pattern.permute.xlu1 %v3499_v63  ;;  %v1269_v24 = vand.u32 127, %v1268_v23 }
  0x10   :  { %3365 = vmatpush3.bf16.msra.mxu0 %v3364_v25  ;;  %v67_v36 = vld [vmem:[%s4037_s2 + $0xb8] sm:$0xff]  ;;  %v3376_v37 = vpack.c.bf16 %v63_v34, %v62_v33  ;;  %v69_v40 = vld [vmem:[%s4037_s2 + $0xc8] sm:$0xff]  ;;  %v72_v41 = vld [vmem:[%s4037_s2 + $0xe0] sm:$0xff]  ;;  %3429 = vset.pattern.permute.xlu0 %v3499_v63 }
  0x11   :  { %3371 = vmatpush3.bf16.msra.mxu1 %v3370_v26  ;;  %3372 = vmatprep.subr.bf16.mxu0 %v3495_v3  ;;  %v3382_v38 = vpack.c.bf16 %v67_v36, %v66_v35  ;;  %v73_v42 = vld [vmem:[%s4037_s2 + $0xe8] sm:$0xff]  ;;  %v3385_v44 = vpack.c.bf16 %v69_v40, %v68_v39  ;;  %v70_v46 = vld [vmem:[%s4037_s2 + $0xd0] sm:$0xff]  ;;  %v71_v47 = vld [vmem:[%s4037_s2 + $0xd8] sm:$0xff] }
  0x12   :  { %3378 = vmatprep.subr.bf16.mxu1 %v3495_v3  ;;  %v3693_v43 = vld [vmem:[%s4035_s0 + $0x8] sm:$0xff]  ;;  %v3391_v45 = vpack.c.bf16 %v73_v42, %v72_v41  ;;  %v74_v48 = vld [vmem:[%s4037_s2 + $0xf0] sm:$0xff]  ;;  %v75_v49 = vld [vmem:[%s4037_s2 + $0xf8] sm:$0xff]  ;;  %v3388_v50 = vpack.c.bf16 %v71_v47, %v70_v46  ;;  %s3498_s2 = smov 120  }
  0x13   :  { %3141 = vmatmul.mubr.msk.f32.vlgmr.msra.gmra.mrb[2].mxu0 %vm76_vm1, %v3616_v18  ;;  %v3394_v51 = vpack.c.bf16 %v75_v49, %v74_v48  ;;  %v2972_v5 = vld [vmem:[%s4036_s1] ss:$0 sm:$0xff]  ;;  %v2973_v6 = vld [vmem:[%s4036_s1 + $0x1] ss:$0 sm:$0xff]  ;;  %v2975_v7 = vld [vmem:[%s4036_s1 + $0x3] ss:$0 sm:$0xff] }
  0x14   :  { %3152 = vmatmul.mubr.msk.f32.vlgmr.msra.gmra.mrb[2].mxu1 %vm76_vm1, %v3616_v18  ;;  %3374 = vmatpush3.bf16.msra.mxu0 %v3373_v31  ;;  %v2974_v8 = vld [vmem:[%s4036_s1 + $0x2] ss:$0 sm:$0xff]  ;;  %v2977_v9 = vld [vmem:[%s4036_s1 + $0x5] ss:$0 sm:$0xff]  ;;  %v2976_v10 = vld [vmem:[%s4036_s1 + $0x4] ss:$0 sm:$0xff] }
  0x15   :  { %3380 = vmatpush3.bf16.msra.mxu1 %v3379_v32  ;;  %3375 = vmatprep.subr.bf16.mxu0 %v3495_v3  ;;  %v2979_v12 = vld [vmem:[%s4036_s1 + $0x7] ss:$0 sm:$0xff]  ;;  %v2978_v13 = vld [vmem:[%s4036_s1 + $0x6] ss:$0 sm:$0xff]  ;;  %s3500_s1 = smov 112  }
  0x16   :  { %3381 = vmatprep.subr.bf16.mxu1 %v3495_v3  ;;  %3162 = vmatprep.mubr.msk.f32.mxu0 %vm3496_vm0, %v3497_v11 }
  0x17   :  { %3173 = vmatprep.mubr.msk.f32.mxu1 %vm3496_vm0, %v3497_v11 }
  0x18   :  { %3377 = vmatpush3.bf16.msra.mxu0 %v3376_v37 }
  0x19   :  { %3383 = vmatpush3.bf16.msra.mxu1 %v3382_v38  ;;  %3384 = vmatprep.subr.bf16.mxu0 %v3495_v3 }
  0x1a   :  { %3390 = vmatprep.subr.bf16.mxu1 %v3495_v3 }
  0x1b   :  { %3163 = vmatmul.mubr.msk.f32.vlgmr.msra.gmra.mrb[4].mxu0 %vm76_vm1, %v3693_v43 }
  0x1c   :  { %3174 = vmatmul.mubr.msk.f32.vlgmr.msra.gmra.mrb[4].mxu1 %vm76_vm1, %v3693_v43  ;;  %3386 = vmatpush3.bf16.msra.mxu0 %v3385_v44 }
  0x1d   :  { %3392 = vmatpush3.bf16.msra.mxu1 %v3391_v45  ;;  %3387 = vmatprep.subr.bf16.mxu0 %v3495_v3 }
  0x1e   :  { %3393 = vmatprep.subr.bf16.mxu1 %v3495_v3  ;;  %3184 = vmatprep.mubr.msk.f32.mxu0 %vm3496_vm0, %v3497_v11 }
  0x1f   :  { %3195 = vmatprep.mubr.msk.f32.mxu1 %vm3496_vm0, %v3497_v11 }
  0x20   :  { %3389 = vmatpush3.bf16.msra.mxu0 %v3388_v50 }
  0x21   :  { %3395 = vmatpush3.bf16.msra.mxu1 %v3394_v51  ;;  %3198 = vmatprep.subr.mxu0 %v3497_v11 }
  0x22   :  { %3213 = vmatprep.subr.mxu1 %v3497_v11 }
  0x23   :  { %3185 = vmatmul.mubr.msk.f32.vlgmr.msra.gmra.mrb[6].mxu0 %vm76_vm1, %v3693_v43 }
  0x24   :  { %3196 = vmatmul.mubr.msk.f32.vlgmr.msra.gmra.mrb[6].mxu1 %vm76_vm1, %v3693_v43  ;;  %3200 = vmatprep.mubr.msk.f32.mxu0 %vm3496_vm0, %v3497_v11 }
  0x25   :  { %3215 = vmatprep.mubr.msk.f32.mxu1 %vm3496_vm0, %v3497_v11 }
  0xde   :  { %v3729_v52 = vpop.f32.mrb[0].mxu0 }
  0xdf   :  { %644 = vrot.lane.b32.xlu0 %v3729_v52, %s3498_s2  ;;  %v3120_v53 = vpop.f32.mrb[1].mxu0  ;;  %v3732_v54 = vpop.f32.mrb[0].mxu1 }
  0xe0   :  { %v3131_v55 = vpop.f32.mrb[1].mxu1 }
  0xe3   :  { %722 = vrot.lane.b32.xlu0 %v3732_v54, %s3498_s2 }
  0xe6   :  { %v3735_v56 = vpop.f32.mrb[2].mxu0 }
  0xe7   :  { %799 = vrot.lane.b32.xlu1 %v3735_v56, %s3498_s2  ;;  %v3142_v57 = vpop.f32.mrb[3].mxu0  ;;  %v3738_v58 = vpop.f32.mrb[2].mxu1 }
  0xe8   :  { %v3153_v59 = vpop.f32.mrb[3].mxu1 }
  0xeb   :  { %876 = vrot.lane.b32.xlu1 %v3738_v58, %s3498_s2 }
  0xee   :  { %v3741_v60 = vpop.f32.mrb[4].mxu0 }
  0xef   :  { %v3743_v61 = vpop.f32.mrb[4].mxu1  ;;  %953 = vrot.lane.b32.xlu0 %v3741_v60, %s3498_s2  ;;  %v3164_v62 = vpop.f32.mrb[5].mxu0 }
  0xf0   :  { %1030 = vrot.lane.b32.xlu1 %v3743_v61, %s3498_s2  ;;  %v3175_v0 = vpop.f32.mrb[5].mxu1 }
  0xf6   :  { %v3747_v1 = vpop.f32.mrb[6].mxu0 }
  0xf7   :  { %v3749_v2 = vpop.f32.mrb[6].mxu1  ;;  %1107 = vrot.lane.b32.xlu0 %v3747_v1, %s3498_s2  ;;  %v3186_v3 = vpop.f32.mrb[7].mxu0 }
  0xf8   :  { %1184 = vrot.lane.b32.xlu1 %v3749_v2, %s3498_s2  ;;  %v3197_v4 = vpop.f32.mrb[7].mxu1  ;;  %s2937_s2 = sshll.u32 %s3501_s15, 4  ;;  %s2938_s2 = int_to_ptr.vmem [resolvable:$true] %s2937_s2 }
  0xf9   :  { %s3471_s16 = scalar_lea.vmem %s2938_s2, 256  ;;  %p3476_p1 = scmp.lt.s32.totalorder %s2938_s2, %s2938_s2 }
  0xfa   :  { %p3472_p0 = scmp.ne.s32.totalorder %s2938_s2, %s3471_s16  ;;  %p3477_p2 = scmp.lt.s32.totalorder %s3471_s16, %s3471_s16 }
  0xfb   :  { %1311 = vperm.xlu0 %3429, %v2972_v5  }
  0xfc   :  { %1314 = vperm.xlu1 %3430, %v2973_v6   ;;  %p3478_p3 = por %p3477_p2, %p3476_p1 }
  0xfe   :  { %p3479_p4 = pnand %p3478_p3, %p3472_p0 }
  0xff   :  { %1320 = vperm.xlu0 %3429, %v2975_v7  }
 0x100   :  { %1317 = vperm.xlu1 %3430, %v2974_v8  }
 0x103   :  { %1326 = vperm.xlu0 %3429, %v2977_v9  }
 0x104   :  { %1323 = vperm.xlu1 %3430, %v2976_v10  }
 0x107   :  { %1332 = vperm.xlu0 %3429, %v2979_v12  }
 0x108   :  { %1329 = vperm.xlu1 %3430, %v2978_v13  }
 0x151   :  { %v645_v14 = vpop.permute.xlu0 %644 }
 0x152   :  { %3199 = vmatpush3.xpose.msk.msra.mxu0 %vm646_vm2, %v645_v14 }
 0x153   :  { %3203 = vmatprep.subr.mxu0 %v3497_v11 }
 0x155   :  { %3201 = vmatmul.mubr.msk.f32.vlgmr.msra.gmra.mrb[8].mxu0 %vm646_vm2, %v3729_v52  ;;  %v723_v15 = vpop.permute.xlu0 %722 }
 0x156   :  { %3204 = vmatpush3.xpose.msk.msra.mxu0 %vm646_vm2, %v723_v15  ;;  %3205 = vmatprep.mubr.msk.f32.mxu0 %vm3496_vm0, %v3497_v11 }
 0x157   :  { %3208 = vmatprep.subr.mxu0 %v3497_v11 }
 0x159   :  { %3206 = vmatmul.mubr.msk.f32.vlgmr.msra.gmra.mrb[10].mxu0 %vm646_vm2, %v3732_v54  ;;  %v800_v16 = vpop.permute.xlu1 %799 }
 0x15a   :  { %3209 = vmatpush3.xpose.msk.msra.mxu0 %vm646_vm2, %v800_v16  ;;  %3210 = vmatprep.mubr.msk.f32.mxu0 %vm3496_vm0, %v3497_v11 }
 0x15b   :  { %3218 = vmatprep.subr.mxu0 %v3497_v11 }
 0x15d   :  { %3211 = vmatmul.mubr.msk.f32.vlgmr.msra.gmra.mrb[12].mxu0 %vm646_vm2, %v3735_v56  ;;  %v877_v17 = vpop.permute.xlu1 %876 }
 0x15e   :  { %3214 = vmatpush3.xpose.msk.msra.mxu1 %vm646_vm2, %v877_v17  ;;  %3220 = vmatprep.mubr.msk.f32.mxu0 %vm3496_vm0, %v3497_v11 }
 0x15f   :  { %3223 = vmatprep.subr.mxu1 %v3497_v11 }
 0x161   :  { %3216 = vmatmul.mubr.msk.f32.vlgmr.msra.gmra.mrb[8].mxu1 %vm646_vm2, %v3738_v58  ;;  %v954_v19 = vpop.permute.xlu0 %953 }
 0x162   :  { %v1031_v20 = vpop.permute.xlu1 %1030  ;;  %3219 = vmatpush3.xpose.msk.msra.mxu0 %vm646_vm2, %v954_v19  ;;  %3225 = vmatprep.mubr.msk.f32.mxu1 %vm3496_vm0, %v3497_v11 }
 0x163   :  { %3224 = vmatpush3.xpose.msk.msra.mxu1 %vm646_vm2, %v1031_v20  ;;  %3228 = vmatprep.subr.mxu0 %v3497_v11 }
 0x164   :  { %3233 = vmatprep.subr.mxu1 %v3497_v11 }
 0x165   :  { %3221 = vmatmul.mubr.msk.f32.vlgmr.msra.gmra.mrb[14].mxu0 %vm646_vm2, %v3741_v60 }
 0x166   :  { %3226 = vmatmul.mubr.msk.f32.vlgmr.msra.gmra.mrb[10].mxu1 %vm646_vm2, %v3743_v61  ;;  %3230 = vmatprep.mubr.msk.f32.mxu0 %vm3496_vm0, %v3497_v11 }
 0x167   :  { %3235 = vmatprep.mubr.msk.f32.mxu1 %vm3496_vm0, %v3497_v11 }
 0x169   :  { %v1108_v21 = vpop.permute.xlu0 %1107 }
 0x16a   :  { %v1185_v22 = vpop.permute.xlu1 %1184  ;;  %3229 = vmatpush3.xpose.msk.msra.mxu0 %vm646_vm2, %v1108_v21 }
 0x16b   :  { %3234 = vmatpush3.xpose.msk.msra.mxu1 %vm646_vm2, %v1185_v22  ;;  %3238 = vmatprep.subr.mxu0 %v3497_v11 }
 0x16c   :  { %3243 = vmatprep.subr.mxu1 %v3497_v11 }
 0x16d   :  { %3231 = vmatmul.mubr.msk.f32.vlgmr.msra.gmra.mrb[16].mxu0 %vm646_vm2, %v3747_v1 }
 0x16e   :  { %3236 = vmatmul.mubr.msk.f32.vlgmr.msra.gmra.mrb[12].mxu1 %vm646_vm2, %v3749_v2  ;;  %3240 = vmatprep.mubr.msk.f32.mxu0 %vm3496_vm0, %v3497_v11 }
 0x16f   :  { %3245 = vmatprep.mubr.msk.f32.mxu1 %vm3496_vm0, %v3497_v11 }
 0x17a   :  { %v1312_v25 = vpop.permute.xlu0 %1311 }
 0x17b   :  { %vm1334_vm3 = vcmp.lt.s32.totalorder %v1269_v24, %v1312_v25  ;;  %v1315_v29 = vpop.permute.xlu1 %1314 }
 0x17c   :  { %vm1335_vm4 = vcmp.lt.s32.totalorder %v1269_v24, %v1315_v29 }
 0x17e   :  { %v1321_v41 = vpop.permute.xlu0 %1320 }
 0x17f   :  { %v1318_v35 = vpop.permute.xlu1 %1317  ;;  %vm1337_vm6 = vcmp.lt.s32.totalorder %v1269_v24, %v1321_v41 }
 0x180   :  { %vm1336_vm5 = vcmp.lt.s32.totalorder %v1269_v24, %v1318_v35 }
 0x182   :  { %v1327_v59 = vpop.permute.xlu0 %1326 }
 0x183   :  { %v1324_v49 = vpop.permute.xlu1 %1323  ;;  %vm1339_vm8 = vcmp.lt.s32.totalorder %v1269_v24, %v1327_v59 }
 0x184   :  { %vm1338_vm7 = vcmp.lt.s32.totalorder %v1269_v24, %v1324_v49 }
 0x186   :  { %v1333_v7 = vpop.permute.xlu0 %1332 }
 0x187   :  { %v1330_v6 = vpop.permute.xlu1 %1329  ;;  %vm1341_vm10 = vcmp.lt.s32.totalorder %v1269_v24, %v1333_v7 }
 0x188   :  { %vm1340_vm9 = vcmp.lt.s32.totalorder %v1269_v24, %v1330_v6 }
 0x228   :  { %v717_v26 = vpop.f32.mrb[8].mxu0 }
 0x229   :  { %v1260_v27 = vmul.f32 0.35355338, %v717_v26  ;;  %v3202_v28 = vpop.f32.mrb[9].mxu0 }
 0x22b   :  { %v3825_v30 = vsel %vm1334_vm3, %v1260_v27, -1000000.0 }
 0x22c   :  { %v794_v31 = vpop.f32.mrb[10].mxu0  ;;  %v1350_v32 = vsel %vm646_vm2, %v3825_v30, -inf }
 0x22d   :  { %v1261_v33 = vmul.f32 0.35355338, %v794_v31  ;;  %1351 = vmax.xlane.f32.xlu1 %v1350_v32  ;;  %v3207_v34 = vpop.f32.mrb[11].mxu0 }
 0x22f   :  { %v3829_v36 = vsel %vm1335_vm4, %v1261_v33, -1000000.0 }
 0x230   :  { %v871_v37 = vpop.f32.mrb[12].mxu0  ;;  %v1353_v38 = vsel %vm646_vm2, %v3829_v36, -inf }
 0x231   :  { %v1262_v39 = vmul.f32 0.35355338, %v871_v37  ;;  %1354 = vmax.xlane.f32.xlu0 %v1353_v38  ;;  %v3212_v40 = vpop.f32.mrb[13].mxu0 }
 0x233   :  { %v1344_v42 = vsel %vm1336_vm5, %v1262_v39, -1000000.0 }
 0x234   :  { %v948_v44 = vpop.f32.mrb[8].mxu1  ;;  %v1356_v45 = vsel %vm646_vm2, %v1344_v42, -inf }
 0x235   :  { %v1263_v46 = vmul.f32 0.35355338, %v948_v44  ;;  %v3217_v47 = vpop.f32.mrb[9].mxu1  ;;  %1357 = vmax.xlane.f32.xlu0 %v1356_v45 }
 0x237   :  { %v1345_v48 = vsel %vm1337_vm6, %v1263_v46, -1000000.0 }
 0x238   :  { %v1025_v50 = vpop.f32.mrb[14].mxu0  ;;  %v1359_v51 = vsel %vm646_vm2, %v1345_v48, -inf }
 0x239   :  { %v1264_v53 = vmul.f32 0.35355338, %v1025_v50  ;;  %v1102_v55 = vpop.f32.mrb[10].mxu1  ;;  %1360 = vmax.xlane.f32.xlu1 %v1359_v51  ;;  %v3222_v57 = vpop.f32.mrb[15].mxu0 }
 0x23a   :  { %v1265_v62 = vmul.f32 0.35355338, %v1102_v55  ;;  %v3227_v63 = vpop.f32.mrb[11].mxu1 }
 0x23b   :  { %v1346_v0 = vsel %vm1338_vm7, %v1264_v53, -1000000.0 }
 0x23c   :  { %v1347_v3 = vsel %vm1339_vm8, %v1265_v62, -1000000.0  ;;  %v1362_v4 = vsel %vm646_vm2, %v1346_v0, -inf }
 0x23d   :  { %v1365_v5 = vsel %vm646_vm2, %v1347_v3, -inf  ;;  %1363 = vmax.xlane.f32.xlu0 %v1362_v4 }
 0x23e   :  { %1366 = vmax.xlane.f32.xlu1 %v1365_v5 }
 0x240   :  { %v1179_v8 = vpop.f32.mrb[16].mxu0 }
 0x241   :  { %v1266_v9 = vmul.f32 0.35355338, %v1179_v8  ;;  %v1256_v10 = vpop.f32.mrb[12].mxu1  ;;  %v3232_v12 = vpop.f32.mrb[17].mxu0 }
 0x242   :  { %v1267_v13 = vmul.f32 0.35355338, %v1256_v10  ;;  %v3237_v14 = vpop.f32.mrb[13].mxu1 }
 0x243   :  { %v1348_v15 = vsel %vm1340_vm9, %v1266_v9, -1000000.0 }
 0x244   :  { %v1349_v16 = vsel %vm1341_vm10, %v1267_v13, -1000000.0  ;;  %v1368_v17 = vsel %vm646_vm2, %v1348_v15, -inf }
 0x245   :  { %v1371_v19 = vsel %vm646_vm2, %v1349_v16, -inf  ;;  %1369 = vmax.xlane.f32.xlu0 %v1368_v17 }
 0x246   :  { %1372 = vmax.xlane.f32.xlu1 %v1371_v19 }
 0x257   :  { %1514 = vrot.lane.b32.xlu1 %v3732_v54, %s3500_s1 }
 0x25b   :  { %1590 = vrot.lane.b32.xlu1 %v3735_v56, %s3500_s1  ;;  %1438 = vrot.lane.b32.xlu0 %v3729_v52, %s3500_s1 }
 0x25f   :  { %1742 = vrot.lane.b32.xlu1 %v3741_v60, %s3500_s1  ;;  %1666 = vrot.lane.b32.xlu0 %v3738_v58, %s3500_s1 }
 0x263   :  { %1818 = vrot.lane.b32.xlu0 %v3743_v61, %s3500_s1 }
 0x2ba   :  { %v1352_v20 = vpop.xlane.xlu1 %1351 }
 0x2bb   :  { %v1374_v21 = vsub.f32 %v3825_v30, %v1352_v20 }
 0x2bd   :  { %v1382_v22 = vmul.f32 1.442695, %v1374_v21 }
 0x2be   :  { %v1355_v54 = vpop.xlane.xlu0 %1354 }
 0x2bf   :  { %3431 = vpow2.f32 %v1382_v22  ;;  %v1375_v56 = vsub.f32 %v3829_v36, %v1355_v54 }
 0x2c1   :  { %v1384_v23 = vmul.f32 1.442695, %v1375_v56 }
 0x2c2   :  { %v1358_v24 = vpop.xlane.xlu0 %1357 }
 0x2c3   :  { %3433 = vpow2.f32 %v1384_v23  ;;  %v1376_v52 = vsub.f32 %v1344_v42, %v1358_v24 }
 0x2c5   :  { %v1386_v25 = vmul.f32 1.442695, %v1376_v52 }
 0x2c6   :  { %v1361_v60 = vpop.xlane.xlu1 %1360 }
 0x2c7   :  { %3435 = vpow2.f32 %v1386_v25  ;;  %v1377_v26 = vsub.f32 %v1345_v48, %v1361_v60 }
 0x2c9   :  { %v3432_v58 = vpop.eup %3431  ;;  %v1388_v27 = vmul.f32 1.442695, %v1377_v26 }
 0x2ca   :  { %v1364_v28 = vpop.xlane.xlu0 %1363  ;;  %v1398_v61 = vsel %vm646_vm2, %v3432_v58, 0.0 }
 0x2cb   :  { %3437 = vpow2.f32 %v1388_v27  ;;  %v1367_v29 = vpop.xlane.xlu1 %1366  ;;  %v1378_v30 = vsub.f32 %v1346_v0, %v1364_v28  ;;  %1399 = vadd.xlane.f32.xlu0 %v1398_v61  ;;  %v2047_v27 = vld [vmem:[%s4038_s3 + $0x8] sm:$0xff]  ;;  %v2048_v28 = vld [vmem:[%s4038_s3 + $0x10] sm:$0xff] }
 0x2cc   :  { %v1379_v31 = vsub.f32 %v1347_v3, %v1367_v29 }
 0x2cd   :  { %v3434_v32 = vpop.eup %3433  ;;  %v1390_v33 = vmul.f32 1.442695, %v1378_v30  ;;  %v2049_v30 = vld [vmem:[%s4038_s3 + $0x18] sm:$0xff] }
 0x2ce   :  { %v1392_v34 = vmul.f32 1.442695, %v1379_v31  ;;  %v1401_v35 = vsel %vm646_vm2, %v3434_v32, 0.0 }
 0x2cf   :  { %3439 = vpow2.f32 %v1390_v33  ;;  %1402 = vadd.xlane.f32.xlu1 %v1401_v35  ;;  %v2050_v33 = vld [vmem:[%s4038_s3 + $0x20] sm:$0xff] }
 0x2d0   :  { %3441 = vpow2.f32 %v1392_v34 }
 0x2d1   :  { %v3436_v36 = vpop.eup %3435 }
 0x2d2   :  { %v1370_v37 = vpop.xlane.xlu0 %1369  ;;  %v1404_v38 = vsel %vm646_vm2, %v3436_v36, 0.0 }
 0x2d3   :  { %v1373_v39 = vpop.xlane.xlu1 %1372  ;;  %v1380_v40 = vsub.f32 %v1348_v15, %v1370_v37  ;;  %1405 = vadd.xlane.f32.xlu0 %v1404_v38 }
 0x2d4   :  { %v1381_v41 = vsub.f32 %v1349_v16, %v1373_v39  ;;  %v2052_v39 = vld [vmem:[%s4038_s3 + $0x30] sm:$0xff] }
 0x2d5   :  { %v3438_v42 = vpop.eup %3437  ;;  %v1394_v44 = vmul.f32 1.442695, %v1380_v40 }
 0x2d6   :  { %v1396_v45 = vmul.f32 1.442695, %v1381_v41  ;;  %v1439_v46 = vpop.permute.xlu0 %1438  ;;  %v1407_v47 = vsel %vm646_vm2, %v3438_v42, 0.0  ;;  %v2053_v41 = vld [vmem:[%s4038_s3 + $0x38] sm:$0xff] }
 0x2d7   :  { %3443 = vpow2.f32 %v1394_v44  ;;  %v1515_v48 = vpop.permute.xlu1 %1514  ;;  %1408 = vadd.xlane.f32.xlu1 %v1407_v47  ;;  %3239 = vmatpush3.msra.mxu0 %v1439_v46 }
 0x2d8   :  { %3445 = vpow2.f32 %v1396_v45  ;;  %3244 = vmatpush3.msra.mxu1 %v1515_v48  ;;  %3248 = vmatprep.subr.mxu0 %v3497_v11 }
 0x2d9   :  { %v3440_v49 = vpop.eup %3439  ;;  %3253 = vmatprep.subr.mxu1 %v3497_v11 }
 0x2da   :  { %v3442_v50 = vpop.eup %3441  ;;  %v1410_v51 = vsel %vm646_vm2, %v3440_v49, 0.0  ;;  %v1667_v63 = vpop.permute.xlu0 %1666 }
 0x2db   :  { %v1413_v53 = vsel %vm646_vm2, %v3442_v50, 0.0  ;;  %1411 = vadd.xlane.f32.xlu0 %v1410_v51  ;;  %v1591_v0 = vpop.permute.xlu1 %1590 }
 0x2dc   :  { %1414 = vadd.xlane.f32.xlu1 %v1413_v53 }
 0x2de   :  { %v1819_v3 = vpop.permute.xlu0 %1818 }
 0x2df   :  { %v1743_v4 = vpop.permute.xlu1 %1742 }
 0x2e1   :  { %v3861_v55 = vpop.eup %3443 }
 0x2e2   :  { %v3863_v57 = vpop.eup %3445  ;;  %v1416_v59 = vsel %vm646_vm2, %v3861_v55, 0.0 }
 0x2e3   :  { %v1419_v62 = vsel %vm646_vm2, %v3863_v57, 0.0  ;;  %1417 = vadd.xlane.f32.xlu0 %v1416_v59 }
 0x2e4   :  { %1420 = vadd.xlane.f32.xlu1 %v1419_v62 }
 0x2f5   :  { %1894 = vrot.lane.b32.xlu1 %v3747_v1, %s3500_s1 }
 0x2f9   :  { %1970 = vrot.lane.b32.xlu0 %v3749_v2, %s3500_s1 }
 0x358   :  { %v1400_v5 = vpop.xlane.xlu0 %1399 }
 0x359   :  { %3447 = vrcp.f32 %v1400_v5 }
 0x35c   :  { %v1403_v6 = vpop.xlane.xlu1 %1402 }
 0x35d   :  { %3449 = vrcp.f32 %v1403_v6 }
 0x360   :  { %v1406_v7 = vpop.xlane.xlu0 %1405 }
 0x361   :  { %3451 = vrcp.f32 %v1406_v7 }
 0x363   :  { %v3448_v8 = vpop.eup %3447 }
 0x364   :  { %v1430_v9 = vmul.f32 %v3448_v8, %v3432_v58  ;;  %v1409_v10 = vpop.xlane.xlu1 %1408  ;;  %v2046_v58 = vld [vmem:[%s4038_s3] sm:$0xff] }
 0x365   :  { %3453 = vrcp.f32 %v1409_v10 }
 0x366   :  { %3241 = vmatmul.mubr.msk.f32.vlgmr.msra.gmra.mrb[18].mxu0 %vm646_vm2, %v1430_v9 }
 0x367   :  { %v3450_v1 = vpop.eup %3449  ;;  %3249 = vmatpush3.msra.mxu0 %v1591_v0  ;;  %3250 = vmatprep.mubr.msk.f32.mxu0 %vm3496_vm0, %v3497_v11 }
 0x368   :  { %v1431_v2 = vmul.f32 %v3450_v1, %v3434_v32  ;;  %v1412_v12 = vpop.xlane.xlu0 %1411  ;;  %3258 = vmatprep.subr.mxu0 %v3497_v11 }
 0x369   :  { %v1415_v13 = vpop.xlane.xlu1 %1414  ;;  %3455 = vrcp.f32 %v1412_v12 }
 0x36a   :  { %3457 = vrcp.f32 %v1415_v13  ;;  %3246 = vmatmul.mubr.msk.f32.vlgmr.msra.gmra.mrb[14].mxu1 %vm646_vm2, %v1431_v2 }
 0x36b   :  { %v3452_v14 = vpop.eup %3451  ;;  %3254 = vmatpush3.msra.mxu1 %v1667_v63  ;;  %3255 = vmatprep.mubr.msk.f32.mxu1 %vm3496_vm0, %v3497_v11 }
 0x36c   :  { %v1432_v15 = vmul.f32 %v3452_v14, %v3436_v36  ;;  %3263 = vmatprep.subr.mxu1 %v3497_v11  ;;  %v2051_v36 = vld [vmem:[%s4038_s3 + $0x28] sm:$0xff] }
 0x36e   :  { %3251 = vmatmul.mubr.msk.f32.vlgmr.msra.gmra.mrb[20].mxu0 %vm646_vm2, %v1432_v15 }
 0x36f   :  { %v3454_v16 = vpop.eup %3453  ;;  %3259 = vmatpush3.msra.mxu0 %v1743_v4  ;;  %3260 = vmatprep.mubr.msk.f32.mxu0 %vm3496_vm0, %v3497_v11 }
 0x370   :  { %v1433_v17 = vmul.f32 %v3454_v16, %v3438_v42  ;;  %v1418_v19 = vpop.xlane.xlu0 %1417  ;;  %3268 = vmatprep.subr.mxu0 %v3497_v11 }
 0x371   :  { %v1421_v20 = vpop.xlane.xlu1 %1420  ;;  %3459 = vrcp.f32 %v1418_v19 }
 0x372   :  { %3461 = vrcp.f32 %v1421_v20  ;;  %3256 = vmatmul.mubr.msk.f32.vlgmr.msra.gmra.mrb[16].mxu1 %vm646_vm2, %v1433_v17 }
 0x373   :  { %v3456_v21 = vpop.eup %3455  ;;  %3264 = vmatpush3.msra.mxu1 %v1819_v3  ;;  %3265 = vmatprep.mubr.msk.f32.mxu1 %vm3496_vm0, %v3497_v11 }
 0x374   :  { %v3458_v22 = vpop.eup %3457  ;;  %v1434_v54 = vmul.f32 %v3456_v21, %v3440_v49  ;;  %3273 = vmatprep.subr.mxu1 %v3497_v11  ;;  %v1971_v24 = vpop.permute.xlu0 %1970 }
 0x375   :  { %v1435_v56 = vmul.f32 %v3458_v22, %v3442_v50  ;;  %v1895_v23 = vpop.permute.xlu1 %1894 }
 0x376   :  { %3261 = vmatmul.mubr.msk.f32.vlgmr.msra.gmra.mrb[22].mxu0 %vm646_vm2, %v1434_v54 }
 0x377   :  { %3266 = vmatmul.mubr.msk.f32.vlgmr.msra.gmra.mrb[18].mxu1 %vm646_vm2, %v1435_v56  ;;  %3269 = vmatpush3.msra.mxu0 %v1895_v23 }
 0x378   :  { %3274 = vmatpush3.msra.mxu1 %v1971_v24  ;;  %3270 = vmatprep.mubr.msk.f32.mxu0 %vm3496_vm0, %v3497_v11 }
 0x379   :  { %3275 = vmatprep.mubr.msk.f32.mxu1 %vm3496_vm0, %v3497_v11  ;;  %3278 = vmatprep.subr.mxu0 %v3497_v11 }
 0x37a   :  { %3283 = vmatprep.subr.mxu1 %v3497_v11 }
 0x37b   :  { %v3460_v52 = vpop.eup %3459 }
 0x37c   :  { %v3462_v25 = vpop.eup %3461  ;;  %v1436_v60 = vmul.f32 %v3460_v52, %v3861_v55 }
 0x37d   :  { %v1437_v26 = vmul.f32 %v3462_v25, %v3863_v57  ;;  %v2694_v25 = vld [vmem:[%s4041_s6 + $0x8] sm:$0xff] }
 0x37e   :  { %3271 = vmatmul.mubr.msk.f32.vlgmr.msra.gmra.mrb[24].mxu0 %vm646_vm2, %v1436_v60 }
 0x37f   :  { %3276 = vmatmul.mubr.msk.f32.vlgmr.msra.gmra.mrb[20].mxu1 %vm646_vm2, %v1437_v26  ;;  %3280 = vmatprep.mubr.msk.f32.mxu0 %vm3496_vm0, %v3497_v11  ;;  %v2695_v26 = vld [vmem:[%s4041_s6 + $0x10] sm:$0xff] }
 0x380   :  { %3285 = vmatprep.mubr.msk.f32.mxu1 %vm3496_vm0, %v3497_v11  ;;  %3279 = vmatpush3.msra.mxu0 %v2046_v58  ;;  %v2696_v58 = vld [vmem:[%s4041_s6 + $0x18] sm:$0xff] }
 0x381   :  { %3288 = vmatprep.subr.mxu0 %v3497_v11  ;;  %3284 = vmatpush3.msra.mxu1 %v2047_v27  ;;  %v3400_v27 = vpack.c.bf16 %v2696_v58, %v2695_v26  ;;  %v3004_v26 = vld [vmem:[%s4045_s10] ss:$0 sm:$0xff] }
 0x382   :  { %3293 = vmatprep.subr.mxu1 %v3497_v11 }
 0x439   :  { %v1510_v61 = vpop.f32.mrb[18].mxu0 }
 0x43a   :  { %v3242_v29 = vpop.f32.mrb[19].mxu0  ;;  %3281 = vmatmul.mubr.msk.f32.vlgmr.msra.gmra.mrb[26].mxu0 %vm646_vm2, %v1510_v61  ;;  %v2788_v61 = vld [vmem:[%s4043_s8 + $0x8] sm:$0xff] }
 0x43b   :  { %3289 = vmatpush3.msra.mxu0 %v2048_v28  ;;  %3290 = vmatprep.mubr.msk.f32.mxu0 %vm3496_vm0, %v3497_v11  ;;  %v2787_v28 = vld [vmem:[%s4043_s8] sm:$0xff]  ;;  %v2789_v29 = vld [vmem:[%s4043_s8 + $0x10] sm:$0xff] }
 0x43c   :  { %3298 = vmatprep.subr.mxu0 %v3497_v11 }
 0x43d   :  { %v1586_v31 = vpop.f32.mrb[14].mxu1 }
 0x43e   :  { %v3247_v32 = vpop.f32.mrb[15].mxu1  ;;  %3286 = vmatmul.mubr.msk.f32.vlgmr.msra.gmra.mrb[22].mxu1 %vm646_vm2, %v1586_v31  ;;  %v2790_v31 = vld [vmem:[%s4043_s8 + $0x18] sm:$0xff] }
 0x43f   :  { %3294 = vmatpush3.msra.mxu1 %v2049_v30  ;;  %3295 = vmatprep.mubr.msk.f32.mxu1 %vm3496_vm0, %v3497_v11  ;;  %v3404_v30 = vpack.c.bf16 %v2788_v61, %v2787_v28  ;;  %v3408_v32 = vpack.c.bf16 %v2790_v31, %v2789_v29  ;;  %v3005_v61 = vld [vmem:[%s4046_s11] ss:$0 sm:$0xff] }
 0x440   :  { %3303 = vmatprep.subr.mxu1 %v3497_v11 }
 0x441   :  { %v1662_v34 = vpop.f32.mrb[20].mxu0 }
 0x442   :  { %v3252_v35 = vpop.f32.mrb[21].mxu0  ;;  %3291 = vmatmul.mubr.msk.f32.vlgmr.msra.gmra.mrb[28].mxu0 %vm646_vm2, %v1662_v34  ;;  %v2792_v34 = vld [vmem:[%s4043_s8 + $0x28] sm:$0xff] }
 0x443   :  { %3299 = vmatpush3.msra.mxu0 %v2050_v33  ;;  %3300 = vmatprep.mubr.msk.f32.mxu0 %vm3496_vm0, %v3497_v11  ;;  %v2791_v33 = vld [vmem:[%s4043_s8 + $0x20] sm:$0xff] }
 0x444   :  { %3308 = vmatprep.subr.mxu0 %v3497_v11  ;;  %v3412_v35 = vpack.c.bf16 %v2792_v34, %v2791_v33 }
 0x445   :  { %v1738_v37 = vpop.f32.mrb[16].mxu1 }
 0x446   :  { %v3257_v38 = vpop.f32.mrb[17].mxu1  ;;  %3296 = vmatmul.mubr.msk.f32.vlgmr.msra.gmra.mrb[24].mxu1 %vm646_vm2, %v1738_v37 }
 0x447   :  { %3304 = vmatpush3.msra.mxu1 %v2051_v36  ;;  %3305 = vmatprep.mubr.msk.f32.mxu1 %vm3496_vm0, %v3497_v11 }
 0x448   :  { %3313 = vmatprep.subr.mxu1 %v3497_v11 }
 0x449   :  { %v1814_v40 = vpop.f32.mrb[22].mxu0 }
 0x44a   :  { %v1890_v42 = vpop.f32.mrb[18].mxu1  ;;  %v3262_v44 = vpop.f32.mrb[23].mxu0  ;;  %3301 = vmatmul.mubr.msk.f32.vlgmr.msra.gmra.mrb[30].mxu0 %vm646_vm2, %v1814_v40 }
 0x44b   :  { %v3267_v45 = vpop.f32.mrb[19].mxu1  ;;  %3306 = vmatmul.mubr.msk.f32.vlgmr.msra.gmra.mrb[26].mxu1 %vm646_vm2, %v1890_v42  ;;  %3309 = vmatpush3.msra.mxu0 %v2052_v39  ;;  %v2996_v42 = vld [vmem:[%s4039_s4] ss:$0 sm:$0xff] }
 0x44c   :  { %3310 = vmatprep.mubr.msk.f32.mxu0 %vm3496_vm0, %v3497_v11  ;;  %3314 = vmatpush3.msra.mxu1 %v2053_v41 }
 0x44d   :  { %3315 = vmatprep.mubr.msk.f32.mxu1 %vm3496_vm0, %v3497_v11  ;;  %3405 = vmatprep.subr.bf16.mxu1 %v3404_v30 }
 0x451   :  { %v1966_v46 = vpop.f32.mrb[24].mxu0 }
 0x452   :  { %v2042_v47 = vpop.f32.mrb[20].mxu1  ;;  %v3272_v48 = vpop.f32.mrb[25].mxu0  ;;  %3311 = vmatmul.mubr.msk.f32.vlgmr.msra.gmra.mrb[32].mxu0 %vm646_vm2, %v1966_v46  ;;  %v2997_v46 = vld [vmem:[%s4040_s5] ss:$0 sm:$0xff] }
 0x453   :  { %v3277_v49 = vpop.f32.mrb[21].mxu1  ;;  %3316 = vmatmul.mubr.msk.f32.vlgmr.msra.gmra.mrb[28].mxu1 %vm646_vm2, %v2042_v47 }
 0x454   :  { %3407 = vmatpush3.bf16.msra.mxu1 %v3404_v30 }
 0x455   :  { %3409 = vmatprep.subr.bf16.mxu1 %v3408_v32 }
 0x458   :  { %3411 = vmatpush3.bf16.msra.mxu1 %v3408_v32 }
 0x459   :  { %3413 = vmatprep.subr.bf16.mxu1 %v3412_v35 }
 0x45c   :  { %3415 = vmatpush3.bf16.msra.mxu1 %v3412_v35 }
 0x50d   :  { %v2123_v50 = vpop.f32.mrb[26].mxu0 }
 0x50e   :  { %v3282_v51 = vpop.f32.mrb[27].mxu0 }
 0x511   :  { %v2196_v53 = vpop.f32.mrb[22].mxu1 }
 0x512   :  { %v2639_v55 = vadd.f32 %v2196_v53, %v2123_v50  ;;  %v3287_v57 = vpop.f32.mrb[23].mxu1 }
 0x513   :  { %v2794_v57 = vld [vmem:[%s4043_s8 + $0x38] sm:$0xff] }
 0x515   :  { %v2269_v59 = vpop.f32.mrb[28].mxu0 }
 0x516   :  { %v2640_v62 = vadd.f32 %v2639_v55, %v2269_v59  ;;  %v3292_v63 = vpop.f32.mrb[29].mxu0  ;;  %v2793_v55 = vld [vmem:[%s4043_s8 + $0x30] sm:$0xff] }
 0x517   :  { %v3416_v59 = vpack.c.bf16 %v2794_v57, %v2793_v55 }
 0x519   :  { %v2342_v0 = vpop.f32.mrb[24].mxu1  ;;  %3417 = vmatprep.subr.bf16.mxu1 %v3416_v59 }
 0x51a   :  { %v2641_v3 = vadd.f32 %v2640_v62, %v2342_v0  ;;  %v3297_v4 = vpop.f32.mrb[25].mxu1  ;;  %3419 = vmatpush3.bf16.msra.mxu1 %v3416_v59  ;;  %v2998_v62 = vld [vmem:[%s4042_s7] ss:$0 sm:$0xff] }
 0x51c   :  { %v2646_v11 = vadd.f32 %v2641_v3, %v3616_v18 }
 0x51d   :  { %v2415_v5 = vpop.f32.mrb[30].mxu0 }
 0x51e   :  { %v2488_v6 = vpop.f32.mrb[26].mxu1  ;;  %v3302_v7 = vpop.f32.mrb[31].mxu0  ;;  %v2650_v8 = vsel %vm76_vm1, %v2646_v11, 0.0 }
 0x51f   :  { %v2643_v9 = vadd.f32 %v2488_v6, %v2415_v5  ;;  %v3307_v10 = vpop.f32.mrb[27].mxu1  ;;  %2651 = vadd.xlane.f32.xlu1 %v2650_v8  ;;  %v3001_v6 = vld [vmem:[%s4044_s9] ss:$0 sm:$0xff] }
 0x525   :  { %v2561_v1 = vpop.f32.mrb[32].mxu0 }
 0x526   :  { %v2644_v2 = vadd.f32 %v2643_v9, %v2561_v1  ;;  %v2634_v12 = vpop.f32.mrb[28].mxu1  ;;  %v3312_v13 = vpop.f32.mrb[33].mxu0 }
 0x527   :  { %v3317_v14 = vpop.f32.mrb[29].mxu1 }
 0x528   :  { %v2645_v15 = vadd.f32 %v2644_v2, %v2634_v12 }
 0x52a   :  { %v2647_v16 = vadd.f32 %v2645_v15, %v3693_v43  ;;  %v2693_v43 = vld [vmem:[%s4041_s6] sm:$0xff] }
 0x52b   :  { %v3396_v60 = vpack.c.bf16 %v2694_v25, %v2693_v43 }
 0x52c   :  { %v2653_v17 = vsel %vm76_vm1, %v2647_v16, 0.0 }
 0x52d   :  { %2654 = vadd.xlane.f32.xlu0 %v2653_v17  ;;  %3397 = vmatprep.subr.bf16.mxu0 %v3396_v60 }
 0x52e   :  { %3399 = vmatpush3.bf16.msra.mxu0 %v3396_v60 }
 0x52f   :  { %3401 = vmatprep.subr.bf16.mxu0 %v3400_v27 }
 0x532   :  { %3403 = vmatpush3.bf16.msra.mxu0 %v3400_v27 }
 0x5ac   :  { %v2652_v18 = vpop.xlane.xlu1 %2651 }
 0x5ad   :  { %v2657_v19 = vmul.f32 0.03125, %v2652_v18 }
 0x5af   :  { %v2659_v20 = vsub.f32 %v2646_v11, %v2657_v19 }
 0x5b1   :  { %v2661_v21 = vmul.f32 %v2659_v20, %v2659_v20 }
 0x5b3   :  { %v2663_v22 = vsel %vm76_vm1, %v2661_v21, 0.0 }
 0x5b4   :  { %2664 = vadd.xlane.f32.xlu0 %v2663_v22 }
 0x5ba   :  { %v2655_v54 = vpop.xlane.xlu0 %2654 }
 0x5bb   :  { %v2658_v56 = vmul.f32 0.03125, %v2655_v54 }
 0x5bd   :  { %v2660_v23 = vsub.f32 %v2647_v16, %v2658_v56 }
 0x5bf   :  { %v2662_v24 = vmul.f32 %v2660_v23, %v2660_v23 }
 0x5c1   :  { %v2666_v52 = vsel %vm76_vm1, %v2662_v24, 0.0 }
 0x5c2   :  { %2667 = vadd.xlane.f32.xlu1 %v2666_v52 }
 0x641   :  { %v2665_v36 = vpop.xlane.xlu0 %2664 }
 0x642   :  { %v2669_v37 = vmul.f32 0.03125, %v2665_v36 }
 0x644   :  { %v2671_v38 = vadd.f32 1e-05, %v2669_v37 }
 0x646   :  { %3463 = vrsqrt.f32 %v2671_v38 }
 0x64f   :  { %v2668_v39 = vpop.xlane.xlu1 %2667 }
 0x650   :  { %v3464_v40 = vpop.eup %3463  ;;  %v2670_v41 = vmul.f32 0.03125, %v2668_v39 }
 0x651   :  { %v2675_v44 = vmul.f32 %v3464_v40, %v2659_v20 }
 0x652   :  { %v2672_v45 = vadd.f32 1e-05, %v2670_v41 }
 0x653   :  { %v2683_v47 = vmul.f32 %v2996_v42, %v2675_v44 }
 0x654   :  { %3465 = vrsqrt.f32 %v2672_v45 }
 0x655   :  { %v2691_v48 = vadd.f32 %v2997_v46, %v2683_v47 }
 0x657   :  { %3326 = vmatprep.mubr.msk.f32.mxu0 %vm76_vm1, %v2691_v48 }
 0x65e   :  { %v3466_v49 = vpop.eup %3465 }
 0x65f   :  { %v2676_v50 = vmul.f32 %v3466_v49, %v2660_v23 }
 0x661   :  { %v2684_v51 = vmul.f32 %v2996_v42, %v2676_v50 }
 0x663   :  { %v2692_v53 = vadd.f32 %v2997_v46, %v2684_v51 }
 0x665   :  { %3327 = vmatmul.mubr.msk.f32.vlgmr.msra.gmra.mrb[34].mxu0 %vm76_vm1, %v2692_v53 }
 0x738   :  { %v3328_v63 = vpop.f32.mrb[34].mxu0 }
 0x739   :  { %v2782_v0 = vadd.f32 %v3328_v63, %v2998_v62  ;;  %v2776_v3 = vpop.f32.mrb[35].mxu0 }
 0x73a   :  { %v2777_v4 = vadd.f32 %v2998_v62, %v2776_v3 }
 0x73b   :  { %v2786_v5 = vmax.f32 %v2782_v0, 0.0 }
 0x73c   :  { %v2785_v11 = vmax.f32 %v2777_v4, 0.0 }
 0x73e   :  { %3345 = vmatprep.mubr.msk.f32.mxu1 %vm2802_vm11, %v2785_v11 }
 0x73f   :  { %3346 = vmatmul.mubr.msk.f32.vlgmr.msra.gmra.mrb[30].mxu1 %vm2802_vm11, %v2786_v5 }
 0x812   :  { %v3347_v7 = vpop.f32.mrb[30].mxu1 }
 0x813   :  { %v2881_v8 = vadd.f32 %v3347_v7, %v3001_v6  ;;  %v2875_v9 = vpop.f32.mrb[31].mxu1 }
 0x814   :  { %v2876_v10 = vadd.f32 %v3001_v6, %v2875_v9 }
 0x815   :  { %v2885_v1 = vadd.f32 %v2881_v8, %v2692_v53 }
 0x816   :  { %v2884_v2 = vadd.f32 %v2876_v10, %v2691_v48 }
 0x817   :  { %v2891_v12 = vsel %vm76_vm1, %v2885_v1, 0.0 }
 0x818   :  { %2892 = vadd.xlane.f32.xlu1 %v2891_v12  ;;  %v2888_v13 = vsel %vm76_vm1, %v2884_v2, 0.0 }
 0x819   :  { %2889 = vadd.xlane.f32.xlu0 %v2888_v13 }
 0x8a5   :  { %v2893_v14 = vpop.xlane.xlu1 %2892 }
 0x8a6   :  { %v2895_v15 = vmul.f32 0.03125, %v2893_v14  ;;  %v2890_v16 = vpop.xlane.xlu0 %2889 }
 0x8a7   :  { %v2894_v17 = vmul.f32 0.03125, %v2890_v16 }
 0x8a8   :  { %v2897_v18 = vsub.f32 %v2885_v1, %v2895_v15 }
 0x8a9   :  { %v2896_v19 = vsub.f32 %v2884_v2, %v2894_v17 }
 0x8aa   :  { %v2899_v20 = vmul.f32 %v2897_v18, %v2897_v18 }
 0x8ab   :  { %v2898_v21 = vmul.f32 %v2896_v19, %v2896_v19 }
 0x8ac   :  { %v2903_v22 = vsel %vm76_vm1, %v2899_v20, 0.0 }
 0x8ad   :  { %2904 = vadd.xlane.f32.xlu1 %v2903_v22  ;;  %v2900_v54 = vsel %vm76_vm1, %v2898_v21, 0.0 }
 0x8ae   :  { %2901 = vadd.xlane.f32.xlu0 %v2900_v54 }
 0x93a   :  { %v2905_v56 = vpop.xlane.xlu1 %2904 }
 0x93b   :  { %v2907_v23 = vmul.f32 0.03125, %v2905_v56  ;;  %v2902_v24 = vpop.xlane.xlu0 %2901 }
 0x93c   :  { %v2906_v52 = vmul.f32 0.03125, %v2902_v24 }
 0x93d   :  { %v2909_v43 = vadd.f32 1e-05, %v2907_v23 }
 0x93e   :  { %v2908_v25 = vadd.f32 1e-05, %v2906_v52 }
 0x93f   :  { %3467 = vrsqrt.f32 %v2909_v43 }
 0x940   :  { %3469 = vrsqrt.f32 %v2908_v25 }
 0x949   :  { %v3468_v60 = vpop.eup %3467 }
 0x94a   :  { %v3470_v58 = vpop.eup %3469  ;;  %v2913_v27 = vmul.f32 %v3468_v60, %v2897_v18 }
 0x94b   :  { %v2912_v28 = vmul.f32 %v3470_v58, %v2896_v19 }
 0x94c   :  { %v2921_v29 = vmul.f32 %v3004_v26, %v2913_v27 }
 0x94d   :  { %v2920_v30 = vmul.f32 %v3004_v26, %v2912_v28 }
 0x94e   :  { %v2929_v31 = vadd.f32 %v3005_v61, %v2921_v29 }
 0x94f   :  { %v2928_v32 = vadd.f32 %v3005_v61, %v2920_v30 }
 0x950   :  { %2931 = vst.msk [vmem:[#allocation2 + $0x8] sm:$0xff] %vm76_vm1, %v2929_v31 }
 0x951   :  { %2930 = vst.msk [vmem:[#allocation2] sm:$0xff] %vm76_vm1, %v2928_v32 }
 0x952   :  { %3482 = shalt.err (!%p3479_p4)
}
 0x953   :  { %s3483_s17 = scalar_lea.hbm %s4047_s12, 256 }
 0x954   :  { %p3484_p5 = scmp.ne.s32.totalorder %s4047_s12, %s3483_s17  ;;  %p3487_p6 = scmp.lt.u32.totalorder %s3483_s17, %s4047_s12 }
 0x956   :  { %p3489_p7 = pnand %p3487_p6, %p3484_p5 }
 0x958   :  { %3492 = shalt.err (!%p3489_p7)
}
 0x959   :  { %s3502_s6 = smov 128   ;;  %s3503_s22 = smov 8  }
 0x95a   :  { %2943 = dma.vmem_to_hbm [thread:$0]  %s2938_s2, 256, %s4047_s12, [#allocation3], %s3502_s6, %s3502_s6, %s3503_s22  }
 0x95b   :  { %3493 = dma.done.wait [#allocation3], 256  }
 0x95c   :  { %3494 = vsyncadd [#allocation3], 4294967040 }
 0x95d   :  { %2947 = vsyncpa [#allocation3], 1 }

</bundles_post_ra>
